<compile_context>
chip_gen: v5e
topology: v5e:2x2
jax: 0.10.0
libtpu: 0.0.40
codegen_flags: <defaults>
</compile_context>

<pallas_src>
import functools

import jax
import jax.numpy as jnp
from jax.experimental import pallas as pl
from jax.experimental.pallas import tpu as pltpu

LAMDA = 0.001  # args.lamda is an external global in the reference; fixed here.


def _air_kernel(tab_ref, idx_ref, loss_ref, norm_ref, *, d, tb):
    """One batch tile.

    tab_ref : [d_pad, n_tot] f32   rows 0..d-1 = [user_table.T | item_table.T]
                                   row  d      = per-row L2 norms of both tables
    idx_ref : [2, 3*tb]      i32   row 0 = [u | pu | nu] indices
                                   row 1 = [i | pi | ni] indices + n_users
    loss_ref: [1, tb]        f32   per-lane -log(sigmoid(x_hat)) (unmasked)
    norm_ref: [1, 3*tb]      f32   per-lane (||U_row|| + ||I_row||) for the
                                   (pos-less, pos, neg) sections (unmasked)
    """
    width = 3 * tb
    tab = tab_ref[...]                      # [d_pad, n_tot]
    idx = idx_ref[...]                      # [2, width]
    n_tot = tab.shape[1]

    # Single iota per step, reused for both comparisons (no per-gather iotas).
    iota = jax.lax.broadcasted_iota(jnp.int32, (n_tot, width), 0)
    uidx = idx[0:1, :]                      # [1, width]
    iidx = idx[1:2, :]                      # [1, width] (already shifted)
    # "Two-hot": 1.0 at the user row and at the shifted item row of each lane.
    twohot = jnp.where((iota == uidx) | (iota == iidx),
                       jnp.float32(1.0), jnp.float32(0.0))   # [n_tot, width]

    # One MXU matmul gathers g, g_pos, g_neg AND the summed row norms.
    gath = jnp.dot(tab, twohot, preferred_element_type=jnp.float32)  # [d_pad, width]

    g = gath[0:d, 0:tb]                     # u  + it
    g_pos = gath[0:d, tb:2 * tb]            # pu + pi
    g_neg = gath[0:d, 2 * tb:3 * tb]        # nu + ni

    # x_hat: reduce over the factor dim (sublanes) -> lane-dense [1, tb].
    x_hat = jnp.sum(g * (g_pos - g_neg), axis=0, keepdims=True)

    # -log(sigmoid(x)) = softplus(-x), numerically stable form.
    z = -x_hat
    loss_ref[...] = jnp.maximum(z, 0.0) + jnp.log(1.0 + jnp.exp(-jnp.abs(z)))

    # Row d of the gather is exactly ||U[u_idx]|| + ||I[i_idx]|| per lane.
    norm_ref[...] = gath[d:d + 1, :]


def air_forward(embed_user_w, embed_item_w,
                user, item, pos_user, pos_item, neg_user, neg_item,
                *, lamda=LAMDA, tile_b=512):
    """Fused AIR forward: gathers + g_func + BPR loss + L2 reg in one kernel."""
    assert tile_b % 128 == 0, "tile_b must be a multiple of 128 lanes"
    B = user.shape[0]
    n_users, D = embed_user_w.shape
    n_items = embed_item_w.shape[0]
    n_tot = n_users + n_items

    num_tiles = pl.cdiv(B, tile_b)
    b_pad = num_tiles * tile_b
    width = 3 * tile_b

    # Augmented table: [D | row-norms | zero-pad] x [user_table.T | item_table.T]
    uw = embed_user_w.astype(jnp.float32)
    iw = embed_item_w.astype(jnp.float32)
    d_pad = ((D + 1 + 7) // 8) * 8
    tab = jnp.concatenate([uw.T, iw.T], axis=1)                     # [D, n_tot]
    row_norms = jnp.concatenate(
        [jnp.sqrt(jnp.sum(uw * uw, axis=1)),
         jnp.sqrt(jnp.sum(iw * iw, axis=1))])[None, :]              # [1, n_tot]
    tab_aug = jnp.concatenate(
        [tab, row_norms,
         jnp.zeros((d_pad - D - 1, n_tot), jnp.float32)], axis=0)   # [d_pad, n_tot]

    # Pack all six index vectors into ONE array: one DMA per grid step.
    def prep(idx, offset):
        idx = jnp.asarray(idx, jnp.int32)
        # pad with 0 -> a valid row; padded lanes are dropped in the wrapper.
        idx = jnp.pad(idx, (0, b_pad - B)) + offset
        return idx.reshape(num_tiles, tile_b)

    u_r = prep(user, 0)
    pu_r = prep(pos_user, 0)
    nu_r = prep(neg_user, 0)
    i_r = prep(item, n_users)
    pi_r = prep(pos_item, n_users)
    ni_r = prep(neg_item, n_users)

    # Per-tile lane layout: [u | pu | nu] (row 0) and [i | pi | ni] (row 1).
    uidx = jnp.stack([u_r, pu_r, nu_r], axis=1).reshape(1, num_tiles * width)
    iidx = jnp.stack([i_r, pi_r, ni_r], axis=1).reshape(1, num_tiles * width)
    idx_all = jnp.concatenate([uidx, iidx], axis=0)   # [2, num_tiles*width]

    tab_spec = pl.BlockSpec((d_pad, n_tot), lambda b: (0, 0))
    idx_spec = pl.BlockSpec((2, width), lambda b: (0, b))
    loss_spec = pl.BlockSpec((1, tile_b), lambda b: (0, b))
    norm_spec = pl.BlockSpec((1, width), lambda b: (0, b))

    kernel = functools.partial(_air_kernel, d=D, tb=tile_b)

    cost = pl.CostEstimate(
        flops=int(num_tiles * (2 * d_pad * n_tot * width + 4 * D * tile_b)),
        transcendentals=int(2 * b_pad),
        bytes_accessed=int(d_pad * n_tot * 4 + 2 * num_tiles * width * 4
                           + (b_pad + num_tiles * width) * 4),
    )

    loss_lanes, norm_lanes = pl.pallas_call(
        kernel,
        out_shape=(jax.ShapeDtypeStruct((1, b_pad), jnp.float32),
                   jax.ShapeDtypeStruct((1, num_tiles * width), jnp.float32)),
        grid_spec=pltpu.PrefetchScalarGridSpec(
            num_scalar_prefetch=0,
            grid=(num_tiles,),
            in_specs=[tab_spec, idx_spec],
            out_specs=(loss_spec, norm_spec),
        ),
        compiler_params=pltpu.CompilerParams(
            dimension_semantics=("parallel",)),
        cost_estimate=cost,
    )(tab_aug, idx_all)

    # Final reductions + padded-lane masking in the wrapper (lane-dense outs).
    loss = jnp.sum(loss_lanes[0, :B])
    norms3 = norm_lanes.reshape(num_tiles, 3, tile_b)
    per_elem = jnp.sum(norms3, axis=1).reshape(b_pad)   # sum of all 6 norms / elem
    reg = jnp.float32(lamda) * jnp.sum(per_elem[:B])
    return loss, reg


def air_forward_ref(embed_user_w, embed_item_w,
                    user, item, pos_user, pos_item, neg_user, neg_item,
                    lamda=LAMDA):
    """Pure-JAX reference for verification."""
    u = embed_user_w[user]
    it = embed_item_w[item]
    pu = embed_user_w[pos_user]
    pi = embed_item_w[pos_item]
    nu = embed_user_w[neg_user]
    ni = embed_item_w[neg_item]
    g = u + it
    g_pos = pu + pi
    g_neg = nu + ni
    x_hat = jnp.sum(g * (g_pos - g_neg), axis=1)
    loss = -jnp.sum(jax.nn.log_sigmoid(x_hat))
    reg = sum(jnp.sum(jnp.linalg.norm(r, axis=1))
              for r in (u, it, pu, pi, nu, ni))
    return loss, reg * lamda


if __name__ == "__main__":
    key = jax.random.PRNGKey(0)
    user_num, item_num, factor_num = 16, 24, 32
    batch = 300   # not a multiple of the lane tile -> exercises padded lanes.

    k1, k2, k3, k4, k5, k6, k7, k8 = jax.random.split(key, 8)
    # nn.init.normal_(std=0.01)
    embed_user_w = 0.01 * jax.random.normal(k1, (user_num, factor_num),
                                            dtype=jnp.float32)
    embed_item_w = 0.01 * jax.random.normal(k2, (item_num, factor_num),
                                            dtype=jnp.float32)

    user = jax.random.randint(k3, (batch,), 0, user_num)
    item = jax.random.randint(k4, (batch,), 0, item_num)
    pos_user = jax.random.randint(k5, (batch,), 0, user_num)
    pos_item = jax.random.randint(k6, (batch,), 0, item_num)
    neg_user = jax.random.randint(k7, (batch,), 0, user_num)
    neg_item = jax.random.randint(k8, (batch,), 0, item_num)

    loss_ref, reg_ref = air_forward_ref(embed_user_w, embed_item_w,
                                        user, item, pos_user, pos_item,
                                        neg_user, neg_item)

    # Default large tile (single grid step, padded lanes masked in wrapper).
    loss, reg = air_forward(embed_user_w, embed_item_w,
                            user, item, pos_user, pos_item,
                            neg_user, neg_item)
    jax.block_until_ready((loss, reg))
    assert jnp.allclose(loss, loss_ref, rtol=1e-4, atol=1e-4), (loss, loss_ref)
    assert jnp.allclose(reg, reg_ref, rtol=1e-4, atol=1e-4), (reg, reg_ref)

    # Smaller tile -> multi-step parallel grid path also exercised.
    loss2, reg2 = air_forward(embed_user_w, embed_item_w,
                              user, item, pos_user, pos_item,
                              neg_user, neg_item, tile_b=128)
    jax.block_until_ready((loss2, reg2))
    assert jnp.allclose(loss2, loss_ref, rtol=1e-4, atol=1e-4), (loss2, loss_ref)
    assert jnp.allclose(reg2, reg_ref, rtol=1e-4, atol=1e-4), (reg2, reg_ref)

    print("KERNEL_OK")
</pallas_src>

<mosaic_0001>
module attributes {stable_mosaic.version = 11 : i64} {
  func.func @_air_kernel(%arg0: i32, %arg1: memref<40x40xf32, #tpu.memory_space<vmem>>, %arg2: memref<2x1536xi32, #tpu.memory_space<vmem>>, %arg3: memref<1x512xf32, #tpu.memory_space<vmem>>, %arg4: memref<1x1536xf32, #tpu.memory_space<vmem>>) attributes {dimension_semantics = [#tpu.dimension_semantics<parallel>], iteration_bounds = array<i64: 1>, scalar_prefetch = 0 : i64, scratch_operands = 0 : i64, tpu.core_type = #tpu.core_type<tc>, window_params = [{pipeline_mode = #tpu.pipeline_mode<synchronous>, transform_indices = @transform_0, window_bounds = array<i64: 40, 40>}, {transform_indices = @transform_1, window_bounds = array<i64: 2, 1536>}, {transform_indices = @transform_2, window_bounds = array<i64: 1, 512>}, {transform_indices = @transform_3, window_bounds = array<i64: 1, 1536>}]} {
    %c0 = arith.constant 0 : index
    %c0_0 = arith.constant 0 : index
    %0 = vector.load %arg1[%c0, %c0_0] : memref<40x40xf32, #tpu.memory_space<vmem>>, vector<40x40xf32>
    %c0_1 = arith.constant 0 : index
    %c0_2 = arith.constant 0 : index
    %1 = vector.load %arg2[%c0_1, %c0_2] : memref<2x1536xi32, #tpu.memory_space<vmem>>, vector<2x1536xi32>
    %2 = tpu.iota {dimensions = array<i32: 0>} : vector<40x1536xi32>
    %3 = vector.extract_strided_slice %1 {offsets = [0, 0], sizes = [1, 1536], strides = [1, 1]} : vector<2x1536xi32> to vector<1x1536xi32>
    %4 = vector.extract_strided_slice %1 {offsets = [1, 0], sizes = [1, 1536], strides = [1, 1]} : vector<2x1536xi32> to vector<1x1536xi32>
    %5 = vector.broadcast %3 : vector<1x1536xi32> to vector<40x1536xi32>
    %6 = arith.cmpi eq, %2, %5 : vector<40x1536xi32>
    %7 = vector.broadcast %4 : vector<1x1536xi32> to vector<40x1536xi32>
    %8 = arith.cmpi eq, %2, %7 : vector<40x1536xi32>
    %9 = arith.ori %6, %8 : vector<40x1536xi1>
    %cst = arith.constant 1.000000e+00 : f32
    %cst_3 = arith.constant 0.000000e+00 : f32
    %10 = vector.broadcast %cst : f32 to vector<40x1536xf32>
    %11 = vector.broadcast %cst_3 : f32 to vector<40x1536xf32>
    %12 = arith.select %9, %10, %11 : vector<40x1536xi1>, vector<40x1536xf32>
    %cst_4 = arith.constant dense<0.000000e+00> : vector<40x1536xf32>
    %13 = tpu.matmul %0, %12, %cst_4 {dimension_numbers = #tpu.dot_dimension_numbers<[1], [0], [0], [1], [0, 0, 1, 1], [], []>} : vector<40x40xf32>, vector<40x1536xf32>, vector<40x1536xf32> -> vector<40x1536xf32>
    %14 = vector.extract_strided_slice %13 {offsets = [0, 0], sizes = [32, 512], strides = [1, 1]} : vector<40x1536xf32> to vector<32x512xf32>
    %15 = vector.extract_strided_slice %13 {offsets = [0, 512], sizes = [32, 512], strides = [1, 1]} : vector<40x1536xf32> to vector<32x512xf32>
    %16 = vector.extract_strided_slice %13 {offsets = [0, 1024], sizes = [32, 512], strides = [1, 1]} : vector<40x1536xf32> to vector<32x512xf32>
    %17 = arith.subf %15, %16 : vector<32x512xf32>
    %18 = arith.mulf %14, %17 : vector<32x512xf32>
    %cst_5 = arith.constant dense<0.000000e+00> : vector<512xf32>
    %19 = vector.multi_reduction <add>, %18, %cst_5 [0] : vector<32x512xf32> to vector<512xf32>
    %20 = vector.shape_cast %19 : vector<512xf32> to vector<1x512xf32>
    %cst_6 = arith.constant 0.000000e+00 : f32
    %21 = vector.broadcast %cst_6 : f32 to vector<1x512xf32>
    %22 = arith.subf %21, %20 : vector<1x512xf32>
    %cst_7 = arith.constant 0.000000e+00 : f32
    %23 = vector.broadcast %cst_7 : f32 to vector<1x512xf32>
    %24 = arith.maximumf %22, %23 : vector<1x512xf32>
    %25 = math.absf %22 : vector<1x512xf32>
    %cst_8 = arith.constant 0.000000e+00 : f32
    %26 = vector.broadcast %cst_8 : f32 to vector<1x512xf32>
    %27 = arith.subf %26, %25 : vector<1x512xf32>
    %28 = math.exp %27 : vector<1x512xf32>
    %cst_9 = arith.constant 1.000000e+00 : f32
    %29 = vector.broadcast %cst_9 : f32 to vector<1x512xf32>
    %30 = arith.addf %29, %28 : vector<1x512xf32>
    %31 = math.log %30 : vector<1x512xf32>
    %32 = arith.addf %24, %31 : vector<1x512xf32>
    %c0_10 = arith.constant 0 : index
    %c0_11 = arith.constant 0 : index
    %33 = vector.load %arg3[%c0_10, %c0_11] : memref<1x512xf32, #tpu.memory_space<vmem>>, vector<1x512xf32>
    tpu.vector_store %arg3[%c0_10, %c0_11], %32 {strides = array<i32>} : memref<1x512xf32, #tpu.memory_space<vmem>>, vector<1x512xf32>,
    %34 = vector.extract_strided_slice %13 {offsets = [32, 0], sizes = [1, 1536], strides = [1, 1]} : vector<40x1536xf32> to vector<1x1536xf32>
    %c0_12 = arith.constant 0 : index
    %c0_13 = arith.constant 0 : index
    %35 = vector.load %arg4[%c0_12, %c0_13] : memref<1x1536xf32, #tpu.memory_space<vmem>>, vector<1x1536xf32>
    tpu.vector_store %arg4[%c0_12, %c0_13], %34 {strides = array<i32>} : memref<1x1536xf32, #tpu.memory_space<vmem>>, vector<1x1536xf32>,
    return
  }
  func.func @transform_0(%arg0: i32) -> (i32, i32) {
    %c0_i32 = arith.constant 0 : i32
    %c0_i32_0 = arith.constant 0 : i32
    %c0_i32_1 = arith.constant 0 : i32
    return %c0_i32, %c0_i32_0 : i32, i32
  }
  func.func @transform_1(%arg0: i32) -> (i32, i32) {
    %c0_i32 = arith.constant 0 : i32
    %c0_i32_0 = arith.constant 0 : i32
    return %c0_i32, %arg0 : i32, i32
  }
  func.func @transform_2(%arg0: i32) -> (i32, i32) {
    %c0_i32 = arith.constant 0 : i32
    %c0_i32_0 = arith.constant 0 : i32
    return %c0_i32, %arg0 : i32, i32
  }
  func.func @transform_3(%arg0: i32) -> (i32, i32) {
    %c0_i32 = arith.constant 0 : i32
    %c0_i32_0 = arith.constant 0 : i32
    return %c0_i32, %arg0 : i32, i32
  }
}

</mosaic_0001>

<bundles_post_ra>
// kernel: tpu_custom_call.1
= control target key start
LH: loop header
LB: loop body
LE: loop exit
PB: predicated region body
PF: predicated region fallthrough
CT: control target
= control target key end

     0   :  { %9 = vsyncpa [#allocation3], 0  ;;  %s1944_s0 = inlined_call_operand.hbm [shape: f32[40,40], index: 0, kind: input, shape index: {}]   ;;  %s1945_s1 = inlined_call_operand.hbm [shape: s32[2,1536], index: 1, kind: input, shape index: {}]   ;;  %s1946_s2 = inlined_call_operand.hbm [shape: f32[1,512], index: 2, kind: output, shape index: {0}]   ;;  %s1947_s3 = inlined_call_operand.hbm [shape: f32[1,1536], index: 3, kind: output, shape index: {1}]  }
   0x1   :  { %10 = vsyncpa [#allocation6], 0 }
   0x2   :  { %11 = vsyncpa [#allocation4], 0 }
   0x3   :  { %12 = vsyncpa [#allocation9], 0  ;;  %s17_s14 = sshll.u32 %s1944_s0, 4  ;;  %s1195_s15 = smov [#allocation2]   ;;  %s18_s14 = int_to_ptr.hbm [resolvable:$true] %s17_s14 }
   0x4   :  { %s19_s16 = sshll.u32 %s1195_s15, 4  ;;  %s31_s19 = sshll.u32 %s1945_s1, 4  ;;  %s20_s16 = int_to_ptr.vmem [resolvable:$true] %s19_s16  ;;  %s32_s19 = int_to_ptr.hbm [resolvable:$true] %s31_s19 }
   0x5   :  { %s1196_s20 = smov 128   ;;  %s1197_s21 = smov 8  }
   0x6   :  { %25 = dma.hbm_to_vmem [thread:$0]  %s18_s14, 640, %s20_s16, [#allocation3], %s1196_s20, %s1196_s20, %s1197_s21  }
   0x7   :  { %s1198_s22 = smov [#allocation5]  }
   0x8   :  { %s33_s23 = sshll.u32 %s1198_s22, 4  ;;  %s34_s23 = int_to_ptr.vmem [resolvable:$true] %s33_s23 }
   0x9   :  { %36 = dma.hbm_to_vmem [thread:$0]  %s32_s19, 384, %s34_s23, [#allocation6]  }
   0xa   :  { %1187 = dma.done.wait [#allocation3], 640  }
   0xb   :  { %1188 = vsyncadd [#allocation3], 4294966656 }
   0xc   :  { %1189 = dma.done.wait [#allocation6], 384  }
   0xd   :  { %1190 = vsyncadd [#allocation6], 4294966912  ;;  %v53_v0 = vlaneseq  ;;  %v50_v2 = vld [vmem:[#allocation5] sm:$0xff]  ;;  %v1199_v21 = vmov 1.0   ;;  %v51_v24 = vld [vmem:[#allocation5 + $0x8] sm:$0xff]  ;;  %s1200_s0 = smov [#allocation8]  }
   0xe   :  { %v59_v5 = vperm.slane %v50_v2, 0  ;;  %v143_v6 = vperm.slane %v50_v2, 1  ;;  %v60_v7 = vperm.slane %v50_v2, 2  ;;  %v144_v8 = vperm.slane %v50_v2, 3  ;;  %v1388_v37 = vld [vmem:[#allocation2] sm:$0xff]  ;;  %v1460_v42 = vld [vmem:[#allocation2 + $0x8] sm:$0xff] }
   0xf   :  { %v1229_v1 = vshrl.u32 %v53_v0, 7  ;;  %v61_v9 = vperm.slane %v50_v2, 4  ;;  %v145_v10 = vperm.slane %v50_v2, 5  ;;  %v62_v11 = vperm.slane %v50_v2, 6  ;;  %v52_v43 = vld [vmem:[#allocation5 + $0x10] sm:$0xff]  ;;  %v1515_v48 = vld [vmem:[#allocation2 + $0x10] sm:$0xff] }
  0x10   :  { %v146_v12 = vperm.slane %v50_v2, 7  ;;  %v1237_v13 = vperm.slane %v59_v5, 0  ;;  %v1239_v14 = vperm.slane %v143_v6, 1  ;;  %v1241_v15 = vperm.slane %v60_v7, 0  ;;  %v1625_v59 = vld [vmem:[#allocation2 + $0x18] sm:$0xff]  ;;  %v1691_v62 = vld [vmem:[#allocation2 + $0x20] sm:$0xff] }
  0x11   :  { %v1232_v3 = vadd.s32 32, %v1229_v1  ;;  %v1235_v4 = vadd.s32 24, %v1229_v1  ;;  %v1243_v16 = vperm.slane %v144_v8, 1  ;;  %v1245_v17 = vperm.slane %v61_v9, 0  ;;  %s930_s1 = sshll.u32 %s1200_s0, 4  ;;  %s932_s26 = sshll.u32 %s1947_s3, 4  ;;  %s931_s1 = int_to_ptr.vmem [resolvable:$true] %s930_s1  ;;  %s933_s26 = int_to_ptr.hbm [resolvable:$true] %s932_s26 }
  0x12   :  { %v1247_v18 = vperm.slane %v145_v10, 1  ;;  %v1249_v19 = vperm.slane %v62_v11, 0  ;;  %v1251_v20 = vperm.slane %v146_v12, 1  ;;  %v1275_v22 = vadd.s32 16, %v1229_v1  ;;  %s1201_s3 = smov [#allocation7]   ;;  %s921_s30 = sshll.u32 %s1946_s2, 4  ;;  %s922_s30 = int_to_ptr.hbm [resolvable:$true] %s921_s30 }
  0x13   :  { %vm131_vm0 = vcmp.eq.s32.totalorder %v1232_v3, %v1237_v13  ;;  %vm215_vm1 = vcmp.eq.s32.totalorder %v1232_v3, %v1239_v14  ;;  %vm132_vm2 = vcmp.eq.s32.totalorder %v1232_v3, %v1241_v15  ;;  %vm216_vm3 = vcmp.eq.s32.totalorder %v1232_v3, %v1243_v16  ;;  %s919_s27 = sshll.u32 %s1201_s3, 4  ;;  %s920_s27 = int_to_ptr.vmem [resolvable:$true] %s919_s27 }
  0x14   :  { %vm275_vm4 = vmor %vm131_vm0, %vm215_vm1  ;;  %vm133_vm5 = vcmp.eq.s32.totalorder %v1232_v3, %v1245_v17  ;;  %vm217_vm6 = vcmp.eq.s32.totalorder %v1232_v3, %v1247_v18  ;;  %vm134_vm7 = vcmp.eq.s32.totalorder %v1232_v3, %v1249_v19  ;;  %vm218_vm8 = vcmp.eq.s32.totalorder %v1232_v3, %v1251_v20 }
  0x15   :  { %948 = vmatpush.msk.msra.mxu0 %vm275_vm4, %v1199_v21  ;;  %vm276_vm9 = vmor %vm132_vm2, %vm216_vm3  ;;  %vm119_vm10 = vcmp.eq.s32.totalorder %v1235_v4, %v1237_v13  ;;  %vm203_vm11 = vcmp.eq.s32.totalorder %v1235_v4, %v1239_v14  ;;  %vm120_vm13 = vcmp.eq.s32.totalorder %v1235_v4, %v1241_v15  ;;  %vm204_vm14 = vcmp.eq.s32.totalorder %v1235_v4, %v1243_v16 }
  0x16   :  { %958 = vmatpush.msk.msra.mxu1 %vm276_vm9, %v1199_v21  ;;  %vm277_vm12 = vmor %vm133_vm5, %vm217_vm6  ;;  %vm121_vm0 = vcmp.eq.s32.totalorder %v1235_v4, %v1245_v17  ;;  %vm205_vm1 = vcmp.eq.s32.totalorder %v1235_v4, %v1247_v18  ;;  %vm122_vm3 = vcmp.eq.s32.totalorder %v1235_v4, %v1249_v19  ;;  %vm206_vm4 = vcmp.eq.s32.totalorder %v1235_v4, %v1251_v20 }
  0x17   :  { %968 = vmatpush.msk.msra.mxu2 %vm277_vm12, %v1199_v21  ;;  %vm278_vm15 = vmor %vm134_vm7, %vm218_vm8  ;;  %vm107_vm6 = vcmp.eq.s32.totalorder %v1275_v22, %v1237_v13  ;;  %vm191_vm7 = vcmp.eq.s32.totalorder %v1275_v22, %v1239_v14  ;;  %v1298_v23 = vadd.s32 8, %v1229_v1  ;;  %vm108_vm9 = vcmp.eq.s32.totalorder %v1275_v22, %v1241_v15 }
  0x18   :  { %978 = vmatpush.msk.msra.mxu3 %vm278_vm15, %v1199_v21  ;;  %vm263_vm2 = vmor %vm119_vm10, %vm203_vm11  ;;  %vm192_vm10 = vcmp.eq.s32.totalorder %v1275_v22, %v1243_v16  ;;  %vm109_vm12 = vcmp.eq.s32.totalorder %v1275_v22, %v1245_v17  ;;  %vm110_vm15 = vcmp.eq.s32.totalorder %v1275_v22, %v1249_v19  ;;  %v65_v25 = vperm.slane %v51_v24, 4 }
  0x19   :  { %949 = vmatpush.msk.msra.mxu0 %vm263_vm2, %v1199_v21  ;;  %vm264_vm5 = vmor %vm120_vm13, %vm204_vm14  ;;  %vm193_vm13 = vcmp.eq.s32.totalorder %v1275_v22, %v1247_v18  ;;  %v149_v26 = vperm.slane %v51_v24, 5  ;;  %v66_v27 = vperm.slane %v51_v24, 6  ;;  %v150_v28 = vperm.slane %v51_v24, 7 }
  0x1a   :  { %959 = vmatpush.msk.msra.mxu1 %vm264_vm5, %v1199_v21  ;;  %vm265_vm8 = vmor %vm121_vm0, %vm205_vm1  ;;  %vm194_vm0 = vcmp.eq.s32.totalorder %v1275_v22, %v1251_v20  ;;  %vm347_vm1 = vcmask 326656   ;;  %v64_v29 = vperm.slane %v51_v24, 2  ;;  %v148_v30 = vperm.slane %v51_v24, 3 }
  0x1b   :  { %969 = vmatpush.msk.msra.mxu2 %vm265_vm8, %v1199_v21  ;;  %vm266_vm11 = vmor %vm122_vm3, %vm206_vm4  ;;  %vm95_vm3 = vcmp.eq.s32.totalorder %v1298_v23, %v1237_v13  ;;  %vm179_vm4 = vcmp.eq.s32.totalorder %v1298_v23, %v1239_v14  ;;  %v63_v31 = vperm.slane %v51_v24, 0  ;;  %v147_v32 = vperm.slane %v51_v24, 1 }
  0x1c   :  { %979 = vmatpush.msk.msra.mxu3 %vm266_vm11, %v1199_v21  ;;  %vm251_vm14 = vmor %vm107_vm6, %vm191_vm7  ;;  %vm96_vm6 = vcmp.eq.s32.totalorder %v1298_v23, %v1241_v15  ;;  %vm180_vm7 = vcmp.eq.s32.totalorder %v1298_v23, %v1243_v16  ;;  %v1358_v33 = vperm.slane %v65_v25, 0  ;;  %v1360_v34 = vperm.slane %v149_v26, 1 }
  0x1d   :  { %950 = vmatpush.msk.msra.mxu0 %vm251_vm14, %v1199_v21  ;;  %vm252_vm2 = vmor %vm108_vm9, %vm192_vm10  ;;  %vm97_vm9 = vcmp.eq.s32.totalorder %v1298_v23, %v1245_v17  ;;  %vm181_vm10 = vcmp.eq.s32.totalorder %v1298_v23, %v1247_v18  ;;  %v1373_v35 = vperm.slane %v66_v27, 0  ;;  %v1375_v36 = vperm.slane %v150_v28, 1 }
  0x1e   :  { %960 = vmatpush.msk.msra.mxu1 %vm252_vm2, %v1199_v21  ;;  %vm253_vm5 = vmor %vm109_vm12, %vm193_vm13  ;;  %vm98_vm12 = vcmp.eq.s32.totalorder %v1298_v23, %v1249_v19  ;;  %vm182_vm13 = vcmp.eq.s32.totalorder %v1298_v23, %v1251_v20  ;;  %v1390_v38 = vperm.slane %v64_v29, 0  ;;  %v1392_v39 = vperm.slane %v148_v30, 1 }
  0x1f   :  { %970 = vmatpush.msk.msra.mxu2 %vm253_vm5, %v1199_v21  ;;  %vm254_vm8 = vmor %vm110_vm15, %vm194_vm0  ;;  %vm83_vm15 = vcmp.eq.s32.totalorder %v1229_v1, %v1237_v13  ;;  %vm167_vm0 = vcmp.eq.s32.totalorder %v1229_v1, %v1239_v14  ;;  %v1405_v40 = vperm.slane %v63_v31, 0  ;;  %v1407_v41 = vperm.slane %v147_v32, 1 }
  0x20   :  { %980 = vmatpush.msk.msra.mxu3 %vm254_vm8, %v1199_v21  ;;  %vm239_vm11 = vmor %vm95_vm3, %vm179_vm4  ;;  %vm84_vm3 = vcmp.eq.s32.totalorder %v1229_v1, %v1241_v15  ;;  %vm168_vm4 = vcmp.eq.s32.totalorder %v1229_v1, %v1243_v16  ;;  %v69_v44 = vperm.slane %v52_v43, 4  ;;  %v153_v45 = vperm.slane %v52_v43, 5 }
  0x21   :  { %951 = vmatpush.msk.msra.mxu0 %vm239_vm11, %v1199_v21  ;;  %vm240_vm14 = vmor %vm96_vm6, %vm180_vm7  ;;  %vm85_vm6 = vcmp.eq.s32.totalorder %v1229_v1, %v1245_v17  ;;  %vm169_vm7 = vcmp.eq.s32.totalorder %v1229_v1, %v1247_v18  ;;  %v70_v46 = vperm.slane %v52_v43, 6  ;;  %v154_v47 = vperm.slane %v52_v43, 7 }
  0x22   :  { %961 = vmatpush.msk.msra.mxu1 %vm240_vm14, %v1199_v21  ;;  %vm241_vm2 = vmor %vm97_vm9, %vm181_vm10  ;;  %vm86_vm9 = vcmp.eq.s32.totalorder %v1229_v1, %v1249_v19  ;;  %vm170_vm10 = vcmp.eq.s32.totalorder %v1229_v1, %v1251_v20  ;;  %v68_v49 = vperm.slane %v52_v43, 2  ;;  %v152_v50 = vperm.slane %v52_v43, 3 }
  0x23   :  { %971 = vmatpush.msk.msra.mxu2 %vm241_vm2, %v1199_v21  ;;  %vm242_vm5 = vmor %vm98_vm12, %vm182_vm13  ;;  %vm137_vm12 = vcmp.eq.s32.totalorder %v1232_v3, %v1358_v33  ;;  %vm221_vm13 = vcmp.eq.s32.totalorder %v1232_v3, %v1360_v34  ;;  %v1550_v51 = vperm.slane %v69_v44, 0  ;;  %v1552_v52 = vperm.slane %v153_v45, 1 }
  0x24   :  { %981 = vmatpush.msk.msra.mxu3 %vm242_vm5, %v1199_v21  ;;  %vm227_vm8 = vmor %vm83_vm15, %vm167_vm0  ;;  %vm138_vm15 = vcmp.eq.s32.totalorder %v1232_v3, %v1373_v35  ;;  %vm222_vm0 = vcmp.eq.s32.totalorder %v1232_v3, %v1375_v36  ;;  %v1567_v53 = vperm.slane %v70_v46, 0  ;;  %v1569_v54 = vperm.slane %v154_v47, 1 }
  0x25   :  { %952 = vmatpush.msk.msra.mxu0 %vm227_vm8, %v1199_v21  ;;  %vm228_vm11 = vmor %vm84_vm3, %vm168_vm4  ;;  %vm136_vm3 = vcmp.eq.s32.totalorder %v1232_v3, %v1390_v38  ;;  %vm220_vm4 = vcmp.eq.s32.totalorder %v1232_v3, %v1392_v39  ;;  %v1583_v55 = vperm.slane %v68_v49, 0  ;;  %v1585_v56 = vperm.slane %v152_v50, 1 }
  0x26   :  { %962 = vmatpush.msk.msra.mxu1 %vm228_vm11, %v1199_v21  ;;  %vm229_vm14 = vmor %vm85_vm6, %vm169_vm7  ;;  %953 = vmatmul.msk.f32.vlgmr.msra.gmra.mxu0 %vm347_vm1, %v1388_v37  ;;  %vm135_vm6 = vcmp.eq.s32.totalorder %v1232_v3, %v1405_v40  ;;  %vm219_vm7 = vcmp.eq.s32.totalorder %v1232_v3, %v1407_v41  ;;  %v67_v57 = vperm.slane %v52_v43, 0  ;;  %v151_v58 = vperm.slane %v52_v43, 1 }
  0x27   :  { %972 = vmatpush.msk.msra.mxu2 %vm229_vm14, %v1199_v21  ;;  %vm230_vm2 = vmor %vm86_vm9, %vm170_vm10  ;;  %963 = vmatmul.msk.f32.vlgmr.msra.gmra.mxu1 %vm347_vm1, %v1388_v37  ;;  %vm125_vm9 = vcmp.eq.s32.totalorder %v1235_v4, %v1358_v33  ;;  %vm209_vm10 = vcmp.eq.s32.totalorder %v1235_v4, %v1360_v34 }
  0x28   :  { %982 = vmatpush.msk.msra.mxu3 %vm230_vm2, %v1199_v21  ;;  %973 = vmatmul.msk.f32.vlgmr.msra.gmra.mxu2 %vm347_vm1, %v1388_v37  ;;  %vm281_vm5 = vmor %vm137_vm12, %vm221_vm13  ;;  %vm126_vm12 = vcmp.eq.s32.totalorder %v1235_v4, %v1373_v35  ;;  %vm210_vm13 = vcmp.eq.s32.totalorder %v1235_v4, %v1375_v36  ;;  %v1638_v60 = vperm.slane %v67_v57, 0  ;;  %v1640_v61 = vperm.slane %v151_v58, 1 }
  0x29   :  { %983 = vmatmul.msk.f32.vlgmr.msra.gmra.mxu3 %vm347_vm1, %v1388_v37  ;;  %1008 = vmatpush.msk.msrb.mxu2 %vm281_vm5, %v1199_v21  ;;  %vm282_vm8 = vmor %vm138_vm15, %vm222_vm0  ;;  %vm124_vm15 = vcmp.eq.s32.totalorder %v1235_v4, %v1390_v38  ;;  %vm208_vm0 = vcmp.eq.s32.totalorder %v1235_v4, %v1392_v39 }
  0x2a   :  { %1018 = vmatpush.msk.msrb.mxu3 %vm282_vm8, %v1199_v21  ;;  %vm280_vm11 = vmor %vm136_vm3, %vm220_vm4  ;;  %vm123_vm3 = vcmp.eq.s32.totalorder %v1235_v4, %v1405_v40  ;;  %vm207_vm4 = vcmp.eq.s32.totalorder %v1235_v4, %v1407_v41 }
  0x2b   :  { %998 = vmatpush.msk.msrb.mxu1 %vm280_vm11, %v1199_v21  ;;  %vm279_vm14 = vmor %vm135_vm6, %vm219_vm7  ;;  %vm113_vm6 = vcmp.eq.s32.totalorder %v1275_v22, %v1358_v33  ;;  %vm197_vm7 = vcmp.eq.s32.totalorder %v1275_v22, %v1360_v34 }
  0x2c   :  { %988 = vmatpush.msk.msrb.mxu0 %vm279_vm14, %v1199_v21  ;;  %vm269_vm2 = vmor %vm125_vm9, %vm209_vm10  ;;  %vm114_vm9 = vcmp.eq.s32.totalorder %v1275_v22, %v1373_v35  ;;  %vm198_vm10 = vcmp.eq.s32.totalorder %v1275_v22, %v1375_v36 }
  0x2d   :  { %1009 = vmatpush.msk.msrb.mxu2 %vm269_vm2, %v1199_v21  ;;  %vm270_vm5 = vmor %vm126_vm12, %vm210_vm13  ;;  %vm112_vm12 = vcmp.eq.s32.totalorder %v1275_v22, %v1390_v38  ;;  %vm196_vm13 = vcmp.eq.s32.totalorder %v1275_v22, %v1392_v39  ;;  %vm101_vm2 = vcmp.eq.s32.totalorder %v1298_v23, %v1358_v33 }
  0x2e   :  { %954 = vmatmul.msk.f32.gmra.mxu0 %vm347_vm1, %v1460_v42  ;;  %1019 = vmatpush.msk.msrb.mxu3 %vm270_vm5, %v1199_v21  ;;  %vm268_vm8 = vmor %vm124_vm15, %vm208_vm0  ;;  %vm111_vm15 = vcmp.eq.s32.totalorder %v1275_v22, %v1405_v40  ;;  %vm195_vm0 = vcmp.eq.s32.totalorder %v1275_v22, %v1407_v41  ;;  %vm102_vm5 = vcmp.eq.s32.totalorder %v1298_v23, %v1373_v35 }
  0x2f   :  { %964 = vmatmul.msk.f32.gmra.mxu1 %vm347_vm1, %v1460_v42  ;;  %vm267_vm11 = vmor %vm123_vm3, %vm207_vm4  ;;  %vm185_vm4 = vcmp.eq.s32.totalorder %v1298_v23, %v1360_v34 }
  0x30   :  { %974 = vmatmul.msk.f32.gmra.mxu2 %vm347_vm1, %v1460_v42  ;;  %999 = vmatpush.msk.msrb.mxu1 %vm268_vm8, %v1199_v21  ;;  %vm257_vm14 = vmor %vm113_vm6, %vm197_vm7  ;;  %vm186_vm6 = vcmp.eq.s32.totalorder %v1298_v23, %v1375_v36 }
  0x31   :  { %984 = vmatmul.msk.f32.gmra.mxu3 %vm347_vm1, %v1460_v42  ;;  %989 = vmatpush.msk.msrb.mxu0 %vm267_vm11, %v1199_v21  ;;  %vm258_vm3 = vmor %vm114_vm9, %vm198_vm10  ;;  %vm100_vm9 = vcmp.eq.s32.totalorder %v1298_v23, %v1390_v38  ;;  %vm184_vm10 = vcmp.eq.s32.totalorder %v1298_v23, %v1392_v39 }
  0x32   :  { %1010 = vmatpush.msk.msrb.mxu2 %vm257_vm14, %v1199_v21  ;;  %1020 = vmatpush.msk.msrb.mxu3 %vm258_vm3, %v1199_v21  ;;  %vm256_vm7 = vmor %vm112_vm12, %vm196_vm13  ;;  %vm99_vm12 = vcmp.eq.s32.totalorder %v1298_v23, %v1405_v40  ;;  %vm183_vm13 = vcmp.eq.s32.totalorder %v1298_v23, %v1407_v41  ;;  %vm90_vm3 = vcmp.eq.s32.totalorder %v1229_v1, %v1373_v35 }
  0x33   :  { %1000 = vmatpush.msk.msrb.mxu1 %vm256_vm7, %v1199_v21  ;;  %vm255_vm8 = vmor %vm111_vm15, %vm195_vm0  ;;  %vm89_vm15 = vcmp.eq.s32.totalorder %v1229_v1, %v1358_v33  ;;  %vm173_vm0 = vcmp.eq.s32.totalorder %v1229_v1, %v1360_v34  ;;  %vm172_vm7 = vcmp.eq.s32.totalorder %v1229_v1, %v1392_v39 }
  0x34   :  { %990 = vmatpush.msk.msrb.mxu0 %vm255_vm8, %v1199_v21  ;;  %vm245_vm11 = vmor %vm101_vm2, %vm185_vm4  ;;  %vm174_vm4 = vcmp.eq.s32.totalorder %v1229_v1, %v1375_v36 }
  0x35   :  { %1011 = vmatpush.msk.msrb.mxu2 %vm245_vm11, %v1199_v21  ;;  %vm246_vm14 = vmor %vm102_vm5, %vm186_vm6  ;;  %vm88_vm6 = vcmp.eq.s32.totalorder %v1229_v1, %v1390_v38 }
  0x36   :  { %955 = vmatmul.msk.f32.gmra.mxu0 %vm347_vm1, %v1515_v48  ;;  %1021 = vmatpush.msk.msrb.mxu3 %vm246_vm14, %v1199_v21  ;;  %vm244_vm2 = vmor %vm100_vm9, %vm184_vm10  ;;  %vm87_vm9 = vcmp.eq.s32.totalorder %v1229_v1, %v1405_v40  ;;  %vm171_vm10 = vcmp.eq.s32.totalorder %v1229_v1, %v1407_v41 }
  0x37   :  { %965 = vmatmul.msk.f32.gmra.mxu1 %vm347_vm1, %v1515_v48  ;;  %vm243_vm5 = vmor %vm99_vm12, %vm183_vm13  ;;  %vm141_vm12 = vcmp.eq.s32.totalorder %v1232_v3, %v1550_v51  ;;  %vm225_vm13 = vcmp.eq.s32.totalorder %v1232_v3, %v1552_v52 }
  0x38   :  { %975 = vmatmul.msk.f32.gmra.mxu2 %vm347_vm1, %v1515_v48  ;;  %1001 = vmatpush.msk.msrb.mxu1 %vm244_vm2, %v1199_v21  ;;  %vm233_vm8 = vmor %vm89_vm15, %vm173_vm0  ;;  %vm142_vm15 = vcmp.eq.s32.totalorder %v1232_v3, %v1567_v53  ;;  %vm226_vm0 = vcmp.eq.s32.totalorder %v1232_v3, %v1569_v54 }
  0x39   :  { %985 = vmatmul.msk.f32.gmra.mxu3 %vm347_vm1, %v1515_v48  ;;  %991 = vmatpush.msk.msrb.mxu0 %vm243_vm5, %v1199_v21  ;;  %vm234_vm11 = vmor %vm90_vm3, %vm174_vm4  ;;  %vm140_vm3 = vcmp.eq.s32.totalorder %v1232_v3, %v1583_v55  ;;  %vm224_vm4 = vcmp.eq.s32.totalorder %v1232_v3, %v1585_v56 }
  0x3a   :  { %1012 = vmatpush.msk.msrb.mxu2 %vm233_vm8, %v1199_v21  ;;  %1022 = vmatpush.msk.msrb.mxu3 %vm234_vm11, %v1199_v21  ;;  %vm232_vm14 = vmor %vm88_vm6, %vm172_vm7  ;;  %vm139_vm7 = vcmp.eq.s32.totalorder %v1232_v3, %v1638_v60  ;;  %vm223_vm8 = vcmp.eq.s32.totalorder %v1232_v3, %v1640_v61 }
  0x3b   :  { %1002 = vmatpush.msk.msrb.mxu1 %vm232_vm14, %v1199_v21  ;;  %vm231_vm2 = vmor %vm87_vm9, %vm171_vm10  ;;  %vm129_vm9 = vcmp.eq.s32.totalorder %v1235_v4, %v1550_v51  ;;  %vm213_vm10 = vcmp.eq.s32.totalorder %v1235_v4, %v1552_v52 }
  0x3c   :  { %992 = vmatpush.msk.msrb.mxu0 %vm231_vm2, %v1199_v21  ;;  %vm285_vm5 = vmor %vm141_vm12, %vm225_vm13  ;;  %vm130_vm12 = vcmp.eq.s32.totalorder %v1235_v4, %v1567_v53  ;;  %vm214_vm13 = vcmp.eq.s32.totalorder %v1235_v4, %v1569_v54 }
  0x3d   :  { %1048 = vmatpush.msk.msra.mxu2 %vm285_vm5, %v1199_v21  ;;  %vm286_vm6 = vmor %vm142_vm15, %vm226_vm0  ;;  %vm128_vm15 = vcmp.eq.s32.totalorder %v1235_v4, %v1583_v55  ;;  %vm212_vm0 = vcmp.eq.s32.totalorder %v1235_v4, %v1585_v56  ;;  %vm211_vm5 = vcmp.eq.s32.totalorder %v1235_v4, %v1640_v61 }
  0x3e   :  { %956 = vmatmul.msk.f32.gmra.mxu0 %vm347_vm1, %v1625_v59  ;;  %1058 = vmatpush.msk.msra.mxu3 %vm286_vm6, %v1199_v21  ;;  %vm284_vm11 = vmor %vm140_vm3, %vm224_vm4  ;;  %vm127_vm4 = vcmp.eq.s32.totalorder %v1235_v4, %v1638_v60  ;;  %vm117_vm6 = vcmp.eq.s32.totalorder %v1275_v22, %v1550_v51 }
  0x3f   :  { %966 = vmatmul.msk.f32.gmra.mxu1 %vm347_vm1, %v1625_v59  ;;  %vm283_vm14 = vmor %vm139_vm7, %vm223_vm8  ;;  %vm201_vm8 = vcmp.eq.s32.totalorder %v1275_v22, %v1552_v52 }
  0x40   :  { %976 = vmatmul.msk.f32.gmra.mxu2 %vm347_vm1, %v1625_v59  ;;  %1038 = vmatpush.msk.msra.mxu1 %vm284_vm11, %v1199_v21  ;;  %vm273_vm2 = vmor %vm129_vm9, %vm213_vm10  ;;  %vm118_vm9 = vcmp.eq.s32.totalorder %v1275_v22, %v1567_v53  ;;  %vm202_vm10 = vcmp.eq.s32.totalorder %v1275_v22, %v1569_v54 }
  0x41   :  { %986 = vmatmul.msk.f32.gmra.mxu3 %vm347_vm1, %v1625_v59  ;;  %1028 = vmatpush.msk.msra.mxu0 %vm283_vm14, %v1199_v21  ;;  %vm274_vm3 = vmor %vm130_vm12, %vm214_vm13  ;;  %vm116_vm12 = vcmp.eq.s32.totalorder %v1275_v22, %v1583_v55  ;;  %vm200_vm13 = vcmp.eq.s32.totalorder %v1275_v22, %v1585_v56 }
  0x42   :  { %1049 = vmatpush.msk.msra.mxu2 %vm273_vm2, %v1199_v21  ;;  %1059 = vmatpush.msk.msra.mxu3 %vm274_vm3, %v1199_v21  ;;  %vm272_vm7 = vmor %vm128_vm15, %vm212_vm0  ;;  %vm115_vm2 = vcmp.eq.s32.totalorder %v1275_v22, %v1638_v60  ;;  %vm199_vm3 = vcmp.eq.s32.totalorder %v1275_v22, %v1640_v61 }
  0x43   :  { %1039 = vmatpush.msk.msra.mxu1 %vm272_vm7, %v1199_v21  ;;  %vm271_vm11 = vmor %vm127_vm4, %vm211_vm5  ;;  %vm105_vm4 = vcmp.eq.s32.totalorder %v1298_v23, %v1550_v51  ;;  %vm189_vm5 = vcmp.eq.s32.totalorder %v1298_v23, %v1552_v52  ;;  %vm106_vm7 = vcmp.eq.s32.totalorder %v1298_v23, %v1567_v53 }
  0x44   :  { %1029 = vmatpush.msk.msra.mxu0 %vm271_vm11, %v1199_v21  ;;  %vm261_vm14 = vmor %vm117_vm6, %vm201_vm8  ;;  %vm190_vm8 = vcmp.eq.s32.totalorder %v1298_v23, %v1569_v54 }
  0x45   :  { %1050 = vmatpush.msk.msra.mxu2 %vm261_vm14, %v1199_v21  ;;  %vm262_vm15 = vmor %vm118_vm9, %vm202_vm10  ;;  %vm104_vm9 = vcmp.eq.s32.totalorder %v1298_v23, %v1583_v55  ;;  %vm188_vm10 = vcmp.eq.s32.totalorder %v1298_v23, %v1585_v56  ;;  %vm103_vm14 = vcmp.eq.s32.totalorder %v1298_v23, %v1638_v60 }
  0x46   :  { %957 = vmatmul.msk.f32.gmra.mxu0 %vm347_vm1, %v1691_v62  ;;  %1060 = vmatpush.msk.msra.mxu3 %vm262_vm15, %v1199_v21  ;;  %vm260_vm0 = vmor %vm116_vm12, %vm200_vm13  ;;  %vm187_vm15 = vcmp.eq.s32.totalorder %v1298_v23, %v1640_v61 }
  0x47   :  { %967 = vmatmul.msk.f32.gmra.mxu1 %vm347_vm1, %v1691_v62  ;;  %vm259_vm6 = vmor %vm115_vm2, %vm199_vm3  ;;  %vm177_vm2 = vcmp.eq.s32.totalorder %v1229_v1, %v1552_v52 }
  0x48   :  { %977 = vmatmul.msk.f32.gmra.mxu2 %vm347_vm1, %v1691_v62  ;;  %1040 = vmatpush.msk.msra.mxu1 %vm260_vm0, %v1199_v21  ;;  %vm249_vm11 = vmor %vm105_vm4, %vm189_vm5  ;;  %vm93_vm0 = vcmp.eq.s32.totalorder %v1229_v1, %v1550_v51  ;;  %vm94_vm4 = vcmp.eq.s32.totalorder %v1229_v1, %v1567_v53  ;;  %vm178_vm5 = vcmp.eq.s32.totalorder %v1229_v1, %v1569_v54 }
  0x49   :  { %987 = vmatmul.msk.f32.gmra.mxu3 %vm347_vm1, %v1691_v62  ;;  %1030 = vmatpush.msk.msra.mxu0 %vm259_vm6, %v1199_v21  ;;  %vm250_vm12 = vmor %vm106_vm7, %vm190_vm8  ;;  %vm92_vm6 = vcmp.eq.s32.totalorder %v1229_v1, %v1583_v55  ;;  %vm176_vm7 = vcmp.eq.s32.totalorder %v1229_v1, %v1585_v56 }
  0x4a   :  { %1051 = vmatpush.msk.msra.mxu2 %vm249_vm11, %v1199_v21  ;;  %1061 = vmatpush.msk.msra.mxu3 %vm250_vm12, %v1199_v21  ;;  %vm248_vm13 = vmor %vm104_vm9, %vm188_vm10  ;;  %vm91_vm9 = vcmp.eq.s32.totalorder %v1229_v1, %v1638_v60  ;;  %vm175_vm10 = vcmp.eq.s32.totalorder %v1229_v1, %v1640_v61 }
  0x4b   :  { %1041 = vmatpush.msk.msra.mxu1 %vm248_vm13, %v1199_v21  ;;  %vm247_vm3 = vmor %vm103_vm14, %vm187_vm15  ;;  %vm864_vm14 = vcmask 1042434   ;;  %vm899_vm15 = vcmask 1044484  }
  0x4c   :  { %1031 = vmatpush.msk.msra.mxu0 %vm247_vm3, %v1199_v21  ;;  %vm237_vm8 = vmor %vm93_vm0, %vm177_vm2  ;;  %vm901_vm0 = vcmask 1046534   ;;  %vm866_vm2 = vcmask 1041408   ;;  %vm903_vm3 = vcmask 1045508  }
  0x4d   :  { %1052 = vmatpush.msk.msra.mxu2 %vm237_vm8, %v1199_v21  ;;  %vm238_vm11 = vmor %vm94_vm4, %vm178_vm5  ;;  %vm905_vm4 = vcmask 1043456   ;;  %vm1928_vm5 = vcmp.lt.s32.totalorder %v53_v0, 512 }
  0x4e   :  { %993 = vmatmul.msk.f32.vlgmr.msrb.gmra.mxu0 %vm347_vm1, %v1388_v37  ;;  %1062 = vmatpush.msk.msra.mxu3 %vm238_vm11, %v1199_v21  ;;  %vm236_vm12 = vmor %vm92_vm6, %vm176_vm7 }
  0x4f   :  { %1003 = vmatmul.msk.f32.vlgmr.msrb.gmra.mxu1 %vm347_vm1, %v1388_v37  ;;  %vm235_vm13 = vmor %vm91_vm9, %vm175_vm10 }
  0x50   :  { %1013 = vmatmul.msk.f32.vlgmr.msrb.gmra.mxu2 %vm347_vm1, %v1388_v37  ;;  %1042 = vmatpush.msk.msra.mxu1 %vm236_vm12, %v1199_v21 }
  0x51   :  { %1023 = vmatmul.msk.f32.vlgmr.msrb.gmra.mxu3 %vm347_vm1, %v1388_v37  ;;  %1032 = vmatpush.msk.msra.mxu0 %vm235_vm13, %v1199_v21 }
  0x56   :  { %994 = vmatmul.msk.f32.gmra.mxu0 %vm347_vm1, %v1460_v42 }
  0x57   :  { %1004 = vmatmul.msk.f32.gmra.mxu1 %vm347_vm1, %v1460_v42 }
  0x58   :  { %1014 = vmatmul.msk.f32.gmra.mxu2 %vm347_vm1, %v1460_v42 }
  0x59   :  { %1024 = vmatmul.msk.f32.gmra.mxu3 %vm347_vm1, %v1460_v42 }
  0x5e   :  { %995 = vmatmul.msk.f32.gmra.mxu0 %vm347_vm1, %v1515_v48 }
  0x5f   :  { %1005 = vmatmul.msk.f32.gmra.mxu1 %vm347_vm1, %v1515_v48 }
  0x60   :  { %1015 = vmatmul.msk.f32.gmra.mxu2 %vm347_vm1, %v1515_v48 }
  0x61   :  { %1025 = vmatmul.msk.f32.gmra.mxu3 %vm347_vm1, %v1515_v48 }
  0x66   :  { %996 = vmatmul.msk.f32.gmra.mxu0 %vm347_vm1, %v1625_v59 }
  0x67   :  { %1006 = vmatmul.msk.f32.gmra.mxu1 %vm347_vm1, %v1625_v59 }
  0x68   :  { %1016 = vmatmul.msk.f32.gmra.mxu2 %vm347_vm1, %v1625_v59 }
  0x69   :  { %1026 = vmatmul.msk.f32.gmra.mxu3 %vm347_vm1, %v1625_v59 }
  0x6e   :  { %997 = vmatmul.msk.f32.gmra.mxu0 %vm347_vm1, %v1691_v62 }
  0x6f   :  { %1007 = vmatmul.msk.f32.gmra.mxu1 %vm347_vm1, %v1691_v62 }
  0x70   :  { %1017 = vmatmul.msk.f32.gmra.mxu2 %vm347_vm1, %v1691_v62 }
  0x71   :  { %1027 = vmatmul.msk.f32.gmra.mxu3 %vm347_vm1, %v1691_v62 }
  0x76   :  { %1033 = vmatmul.msk.f32.vlgmr.msra.gmra.mxu0 %vm347_vm1, %v1388_v37 }
  0x77   :  { %1043 = vmatmul.msk.f32.vlgmr.msra.gmra.mxu1 %vm347_vm1, %v1388_v37 }
  0x78   :  { %1053 = vmatmul.msk.f32.vlgmr.msra.gmra.mxu2 %vm347_vm1, %v1388_v37 }
  0x79   :  { %1063 = vmatmul.msk.f32.vlgmr.msra.gmra.mxu3 %vm347_vm1, %v1388_v37 }
  0x7e   :  { %1034 = vmatmul.msk.f32.gmra.mxu0 %vm347_vm1, %v1460_v42 }
  0x7f   :  { %1044 = vmatmul.msk.f32.gmra.mxu1 %vm347_vm1, %v1460_v42 }
  0x80   :  { %1054 = vmatmul.msk.f32.gmra.mxu2 %vm347_vm1, %v1460_v42 }
  0x81   :  { %1064 = vmatmul.msk.f32.gmra.mxu3 %vm347_vm1, %v1460_v42 }
  0x86   :  { %1035 = vmatmul.msk.f32.gmra.mxu0 %vm347_vm1, %v1515_v48 }
  0x87   :  { %1045 = vmatmul.msk.f32.gmra.mxu1 %vm347_vm1, %v1515_v48 }
  0x88   :  { %1055 = vmatmul.msk.f32.gmra.mxu2 %vm347_vm1, %v1515_v48 }
  0x89   :  { %1065 = vmatmul.msk.f32.gmra.mxu3 %vm347_vm1, %v1515_v48 }
  0x8e   :  { %1036 = vmatmul.msk.f32.gmra.mxu0 %vm347_vm1, %v1625_v59 }
  0x8f   :  { %1046 = vmatmul.msk.f32.gmra.mxu1 %vm347_vm1, %v1625_v59 }
  0x90   :  { %1056 = vmatmul.msk.f32.gmra.mxu2 %vm347_vm1, %v1625_v59 }
  0x91   :  { %1066 = vmatmul.msk.f32.gmra.mxu3 %vm347_vm1, %v1625_v59 }
  0x96   :  { %1037 = vmatmul.msk.f32.gmra.mxu0 %vm347_vm1, %v1691_v62 }
  0x97   :  { %1047 = vmatmul.msk.f32.gmra.mxu1 %vm347_vm1, %v1691_v62 }
  0x98   :  { %1057 = vmatmul.msk.f32.gmra.mxu2 %vm347_vm1, %v1691_v62 }
  0x99   :  { %1067 = vmatmul.msk.f32.gmra.mxu3 %vm347_vm1, %v1691_v62  ;;  %vm862_vm1 = vcmask 1040384  }
  0xa3   :  { %v1835_v63 = vpop.f32.mrf.mxu0 }
  0xa4   :  { %v1837_v1 = vpop.f32.mrf.mxu1 }
  0xab   :  { %v1839_v2 = vpop.f32.mrf.mxu2  ;;  %v1841_v3 = vpop.f32.mrf.mxu0 }
  0xac   :  { %v1843_v4 = vpop.f32.mrf.mxu3  ;;  %v1845_v5 = vpop.f32.mrf.mxu1 }
  0xb3   :  { %v1847_v6 = vpop.f32.mrf.mxu2  ;;  %v1849_v7 = vpop.f32.mrf.mxu0 }
  0xb4   :  { %v1851_v8 = vpop.f32.mrf.mxu3  ;;  %v1853_v9 = vpop.f32.mrf.mxu1 }
  0xbb   :  { %v1855_v10 = vpop.f32.mrf.mxu2  ;;  %v1857_v11 = vpop.f32.mrf.mxu0 }
  0xbc   :  { %v1859_v12 = vpop.f32.mrf.mxu3  ;;  %v1861_v13 = vpop.f32.mrf.mxu1 }
  0xc3   :  { %v1863_v14 = vpop.f32.mrf.mxu2  ;;  %v392_v15 = vpop.f32.mrf.mxu0 }
  0xc4   :  { %v1865_v16 = vpop.f32.mrf.mxu3  ;;  %v424_v17 = vpop.f32.mrf.mxu1 }
  0xc5   :  { %v886_v38 = vrot.slane %v424_v17, 7 }
  0xc7   :  { %v896_v48 = vsel %vm862_vm1, %v392_v15, %v886_v38 }
  0xcb   :  { %v456_v18 = vpop.f32.mrf.mxu2  ;;  %v508_v19 = vpop.f32.mrf.mxu0 }
  0xcc   :  { %v488_v20 = vpop.f32.mrf.mxu3  ;;  %v540_v21 = vpop.f32.mrf.mxu1  ;;  %v887_v39 = vrot.slane %v456_v18, 6 }
  0xcd   :  { %v888_v40 = vrot.slane %v488_v20, 5 }
  0xcf   :  { %v897_v49 = vsel %vm864_vm14, %v887_v39, %v888_v40 }
  0xd0   :  { %v898_v54 = vsel %vm866_vm2, %v896_v48, %v897_v49 }
  0xd3   :  { %v1867_v22 = vpop.f32.mrf.mxu2  ;;  %v511_v23 = vpop.f32.mrf.mxu0 }
  0xd4   :  { %v1869_v24 = vpop.f32.mrf.mxu3  ;;  %v543_v25 = vpop.f32.mrf.mxu1 }
  0xdb   :  { %v1871_v26 = vpop.f32.mrf.mxu2  ;;  %v514_v27 = vpop.f32.mrf.mxu0 }
  0xdc   :  { %v1873_v28 = vpop.f32.mrf.mxu3  ;;  %v546_v29 = vpop.f32.mrf.mxu1 }
  0xe3   :  { %v1875_v30 = vpop.f32.mrf.mxu2  ;;  %v1877_v31 = vpop.f32.mrf.mxu0 }
  0xe4   :  { %v1879_v32 = vpop.f32.mrf.mxu3  ;;  %v1881_v33 = vpop.f32.mrf.mxu1 }
  0xeb   :  { %v1883_v34 = vpop.f32.mrf.mxu2  ;;  %v520_v35 = vpop.f32.mrf.mxu0 }
  0xec   :  { %v1885_v36 = vpop.f32.mrf.mxu3  ;;  %v552_v37 = vpop.f32.mrf.mxu1  ;;  %v889_v41 = vrot.slane %v520_v35, 4 }
  0xed   :  { %v890_v42 = vrot.slane %v552_v37, 3 }
  0xef   :  { %v900_v50 = vsel %vm899_vm15, %v889_v41, %v890_v42 }
  0xf3   :  { %v584_v43 = vpop.f32.mrf.mxu2  ;;  %v636_v44 = vpop.f32.mrf.mxu0 }
  0xf4   :  { %v891_v45 = vrot.slane %v584_v43, 2  ;;  %v616_v46 = vpop.f32.mrf.mxu3  ;;  %v668_v47 = vpop.f32.mrf.mxu1  ;;  %v747_v20 = vsub.f32 %v508_v19, %v636_v44 }
  0xf5   :  { %v892_v51 = vrot.slane %v616_v46, 1  ;;  %v748_v37 = vsub.f32 %v540_v21, %v668_v47 }
  0xf6   :  { %v763_v41 = vmul.f32 %v747_v20, %v1835_v63 }
  0xf7   :  { %v902_v52 = vsel %vm901_vm0, %v891_v45, %v892_v51  ;;  %v764_v43 = vmul.f32 %v748_v37, %v1837_v1 }
  0xf8   :  { %v904_v53 = vsel %vm903_vm3, %v900_v50, %v902_v52 }
  0xf9   :  { %v906_v55 = vsel %vm905_vm4, %v898_v54, %v904_v53 }
  0xfa   :  { %912 = vst [vmem:[#allocation8] sm:$0xff] %v906_v55 }
  0xfb   :  { %v700_v56 = vpop.f32.mrf.mxu2  ;;  %v639_v57 = vpop.f32.mrf.mxu0 }
  0xfc   :  { %v732_v58 = vpop.f32.mrf.mxu3  ;;  %v671_v59 = vpop.f32.mrf.mxu1  ;;  %v751_v62 = vsub.f32 %v511_v23, %v639_v57 }
  0xfd   :  { %v752_v18 = vsub.f32 %v543_v25, %v671_v59  ;;  %v750_v44 = vsub.f32 %v1869_v24, %v732_v58 }
  0xfe   :  { %v767_v39 = vmul.f32 %v751_v62, %v1841_v3 }
  0xff   :  { %v768_v40 = vmul.f32 %v752_v18, %v1845_v5 }
 0x100   :  { %v779_v48 = vadd.f32 %v767_v39, %v763_v41 }
 0x101   :  { %v788_v3 = vadd.f32 %v768_v40, %v764_v43 }
 0x103   :  { %v703_v60 = vpop.f32.mrf.mxu2  ;;  %v642_v61 = vpop.f32.mrf.mxu0 }
 0x104   :  { %v735_v15 = vpop.f32.mrf.mxu3  ;;  %v674_v17 = vpop.f32.mrf.mxu1  ;;  %v755_v35 = vsub.f32 %v514_v27, %v642_v61  ;;  %v753_v19 = vsub.f32 %v1871_v26, %v703_v60 }
 0x105   :  { %v756_v38 = vsub.f32 %v546_v29, %v674_v17  ;;  %v754_v5 = vsub.f32 %v1873_v28, %v735_v15 }
 0x106   :  { %v771_v42 = vmul.f32 %v755_v35, %v1849_v7  ;;  %v749_v7 = vsub.f32 %v1867_v22, %v700_v56  ;;  %v769_v49 = vmul.f32 %v753_v19, %v1847_v6 }
 0x107   :  { %v772_v45 = vmul.f32 %v756_v38, %v1853_v9  ;;  %v770_v28 = vmul.f32 %v754_v5, %v1851_v8 }
 0x108   :  { %v780_v29 = vadd.f32 %v779_v48, %v771_v42  ;;  %v765_v22 = vmul.f32 %v749_v7, %v1839_v2 }
 0x109   :  { %v789_v47 = vadd.f32 %v788_v3, %v772_v45 }
 0x10b   :  { %v706_v23 = vpop.f32.mrf.mxu2  ;;  %v645_v46 = vpop.f32.mrf.mxu0 }
 0x10c   :  { %v738_v25 = vpop.f32.mrf.mxu3  ;;  %v759_v21 = vsub.f32 %v1877_v31, %v645_v46  ;;  %v677_v27 = vpop.f32.mrf.mxu1  ;;  %v757_v1 = vsub.f32 %v1875_v30, %v706_v23 }
 0x10d   :  { %v760_v63 = vsub.f32 %v1881_v33, %v677_v27  ;;  %v758_v26 = vsub.f32 %v1879_v32, %v738_v25  ;;  %v797_v32 = vadd.f32 %v769_v49, %v765_v22 }
 0x10e   :  { %v775_v9 = vmul.f32 %v759_v21, %v1857_v11  ;;  %v773_v51 = vmul.f32 %v757_v1, %v1855_v10  ;;  %v766_v11 = vmul.f32 %v750_v44, %v1843_v4 }
 0x10f   :  { %v776_v31 = vmul.f32 %v760_v63, %v1861_v13  ;;  %v774_v24 = vmul.f32 %v758_v26, %v1859_v12 }
 0x110   :  { %v781_v50 = vadd.f32 %v780_v29, %v775_v9  ;;  %v806_v55 = vadd.f32 %v770_v28, %v766_v11  ;;  %v798_v57 = vadd.f32 %v797_v32, %v773_v51 }
 0x111   :  { %v790_v33 = vadd.f32 %v789_v47, %v776_v31 }
 0x112   :  { %v782_v30 = vrot.slane %v781_v50, 4  ;;  %v807_v58 = vadd.f32 %v806_v55, %v774_v24 }
 0x113   :  { %v791_v52 = vrot.slane %v790_v33, 4  ;;  %v709_v53 = vpop.f32.mrf.mxu2  ;;  %v648_v45 = vpop.f32.mrf.mxu0 }
 0x114   :  { %v783_v54 = vadd.f32 %v782_v30, %v781_v50  ;;  %v761_v13 = vsub.f32 %v1883_v34, %v709_v53  ;;  %v741_v6 = vpop.f32.mrf.mxu3  ;;  %v680_v15 = vpop.f32.mrf.mxu1 }
 0x115   :  { %v792_v56 = vadd.f32 %v791_v52, %v790_v33  ;;  %v762_v8 = vsub.f32 %v1885_v36, %v741_v6  ;;  %v893_v38 = vrot.slane %v680_v15, 7 }
 0x116   :  { %v784_v2 = vrot.slane %v783_v54, 2  ;;  %v777_v10 = vmul.f32 %v761_v13, %v1863_v14 }
 0x117   :  { %v793_v59 = vrot.slane %v792_v56, 2  ;;  %v778_v4 = vmul.f32 %v762_v8, %v1865_v16  ;;  %v907_v3 = vsel %vm862_vm1, %v648_v45, %v893_v38 }
 0x118   :  { %v785_v12 = vadd.f32 %v784_v2, %v783_v54  ;;  %v799_v60 = vadd.f32 %v798_v57, %v777_v10 }
 0x119   :  { %v794_v61 = vadd.f32 %v793_v59, %v792_v56  ;;  %v808_v62 = vadd.f32 %v807_v58, %v778_v4 }
 0x11a   :  { %v786_v17 = vrot.slane %v785_v12, 1  ;;  %v800_v34 = vrot.slane %v799_v60, 4 }
 0x11b   :  { %v795_v18 = vrot.slane %v794_v61, 1  ;;  %v809_v20 = vrot.slane %v808_v62, 4  ;;  %v712_v35 = vpop.f32.mrf.mxu2 }
 0x11c   :  { %v1916_v37 = vadd.f32 %v786_v17, %v785_v12  ;;  %v801_v36 = vadd.f32 %v800_v34, %v799_v60  ;;  %v744_v39 = vpop.f32.mrf.mxu3  ;;  %v894_v41 = vrot.slane %v712_v35, 6 }
 0x11d   :  { %v796_v14 = vadd.f32 %v795_v18, %v794_v61  ;;  %v810_v40 = vadd.f32 %v809_v20, %v808_v62  ;;  %v895_v42 = vrot.slane %v744_v39, 5 }
 0x11e   :  { %v815_v16 = vsub.f32 0.0, %v1916_v37  ;;  %v802_v43 = vrot.slane %v801_v36, 2 }
 0x11f   :  { %v816_v23 = vsub.f32 0.0, %v796_v14  ;;  %v811_v46 = vrot.slane %v810_v40, 2  ;;  %v908_v27 = vsel %vm864_vm14, %v894_v41, %v895_v42 }
 0x120   :  { %v823_v48 = vand.u32 2147483647, %v815_v16  ;;  %v803_v19 = vadd.f32 %v802_v43, %v801_v36  ;;  %v909_v9 = vsel %vm866_vm2, %v907_v3, %v908_v27  ;;  %v819_v15 = vmax.f32 %v815_v16, 0.0 }
 0x121   :  { %v824_v25 = vand.u32 2147483647, %v816_v23  ;;  %v812_v21 = vadd.f32 %v811_v46, %v810_v40  ;;  %913 = vst.msk [vmem:[#allocation8 + $0x8] sm:$0xf] %vm1928_vm5, %v909_v9  ;;  %v820_v8 = vmax.f32 %v816_v23, 0.0 }
 0x122   :  { %v827_v5 = vsub.f32 0.0, %v823_v48  ;;  %v804_v63 = vrot.slane %v803_v19, 1  ;;  %935 = dma.vmem_to_hbm [thread:$0]  %s931_s1, 192, %s933_s26, [#allocation9]  }
 0x123   :  { %v828_v7 = vsub.f32 0.0, %v824_v25  ;;  %v813_v29 = vrot.slane %v812_v21, 1 }
 0x124   :  { %v805_v1 = vadd.f32 %v804_v63, %v803_v19  ;;  %v831_v44 = vmul.f32 1.442695, %v827_v5 }
 0x125   :  { %v833_v47 = vmul.f32 1.442695, %v828_v7  ;;  %v814_v26 = vadd.f32 %v813_v29, %v812_v21 }
 0x126   :  { %v817_v31 = vsub.f32 0.0, %v805_v1 }
 0x127   :  { %1075 = vpow2.f32 %v833_v47  ;;  %v818_v50 = vsub.f32 0.0, %v814_v26 }
 0x128   :  { %v825_v28 = vand.u32 2147483647, %v817_v31  ;;  %1077 = vpow2.f32 %v831_v44  ;;  %v821_v59 = vmax.f32 %v817_v31, 0.0 }
 0x129   :  { %v826_v33 = vand.u32 2147483647, %v818_v50  ;;  %v822_v12 = vmax.f32 %v818_v50, 0.0 }
 0x12a   :  { %v829_v22 = vsub.f32 0.0, %v825_v28 }
 0x12b   :  { %v830_v51 = vsub.f32 0.0, %v826_v33 }
 0x12c   :  { %v835_v30 = vmul.f32 1.442695, %v829_v22 }
 0x12d   :  { %v1076_v11 = vpop.eup %1075  ;;  %v837_v24 = vmul.f32 1.442695, %v830_v51 }
 0x12e   :  { %1079 = vpow2.f32 %v835_v30  ;;  %v840_v52 = vadd.f32 1.0, %v1076_v11  ;;  %v1078_v0 = vpop.eup %1077 }
 0x12f   :  { %1081 = vpow2.f32 %v837_v24  ;;  %v839_v53 = vadd.f32 1.0, %v1078_v0 }
 0x130   :  { %1083 = vlog2.f32 %v840_v52 }
 0x131   :  { %1085 = vlog2.f32 %v839_v53 }
 0x134   :  { %v1080_v32 = vpop.eup %1079 }
 0x135   :  { %v1082_v54 = vpop.eup %1081  ;;  %v841_v13 = vadd.f32 1.0, %v1080_v32 }
 0x136   :  { %v842_v6 = vadd.f32 1.0, %v1082_v54  ;;  %v1084_v55 = vpop.eup %1083 }
 0x137   :  { %1087 = vlog2.f32 %v841_v13  ;;  %v846_v56 = vmul.f32 0.6931472, %v1084_v55  ;;  %v1086_v57 = vpop.eup %1085 }
 0x138   :  { %1089 = vlog2.f32 %v842_v6  ;;  %v844_v60 = vmul.f32 0.6931472, %v1086_v57 }
 0x139   :  { %v852_v10 = vadd.f32 %v846_v56, %v820_v8 }
 0x13a   :  { %v851_v20 = vadd.f32 %v844_v60, %v819_v15 }
 0x13b   :  { %v859_v17 = vrot.slane %v852_v10, 7 }
 0x13d   :  { %v1088_v2 = vpop.eup %1087  ;;  %v863_v36 = vsel %vm862_vm1, %v851_v20, %v859_v17 }
 0x13e   :  { %v1090_v58 = vpop.eup %1089  ;;  %v848_v4 = vmul.f32 0.6931472, %v1088_v2 }
 0x13f   :  { %v850_v61 = vmul.f32 0.6931472, %v1090_v58 }
 0x140   :  { %v853_v62 = vadd.f32 %v848_v4, %v821_v59 }
 0x141   :  { %v854_v34 = vadd.f32 %v850_v61, %v822_v12 }
 0x142   :  { %v860_v18 = vrot.slane %v853_v62, 6 }
 0x143   :  { %v861_v35 = vrot.slane %v854_v34, 5 }
 0x145   :  { %v865_v38 = vsel %vm864_vm14, %v860_v18, %v861_v35 }
 0x146   :  { %v867_v37 = vsel %vm866_vm2, %v863_v36, %v865_v38 }
 0x147   :  { %873 = vst.msk [vmem:[#allocation7] sm:$0xf] %vm1928_vm5, %v867_v37 }
 0x148   :  { %924 = dma.vmem_to_hbm [thread:$0]  %s920_s27, 64, %s922_s30, [#allocation4]  }
 0x149   :  { %1191 = dma.done.wait [#allocation4], 64  }
 0x14a   :  { %1192 = vsyncadd [#allocation4], 4294967232 }
 0x14b   :  { %1193 = dma.done.wait [#allocation9], 192  }
 0x14c   :  { %1194 = vsyncadd [#allocation9], 4294967104 }
 0x14d   :  { %944 = vsyncpa [#allocation3], 1 }
 0x14e   :  { %945 = vsyncpa [#allocation6], 1 }
 0x14f   :  { %946 = vsyncpa [#allocation4], 1 }
 0x150   :  { %947 = vsyncpa [#allocation9], 1 }

</bundles_post_ra>
